<compile_context>
chip_gen: v7x
topology: tpu7x:2x2x1
jax: 0.10.0
libtpu: 0.0.40
codegen_flags: <defaults>
</compile_context>

<pallas_src>
import functools
import math

import jax
import jax.numpy as jnp
from jax.experimental import pallas as pl
from jax.experimental.pallas import tpu as pltpu


# --------------------------------------------------------------------------- helpers
def _divisor_tile(n, cap, granule):
    """Largest multiple of `granule` that divides n and is <= min(n, cap).
    Falls back to n (the full dim) when no such divisor exists."""
    cap = min(cap, n)
    best = None
    d = granule
    while d <= cap:
        if n % d == 0:
            best = d
        d += granule
    return best if best is not None else n


def _vmem_limit_bytes():
    """Generation-aware scoped-VMEM limit (larger on v5e/v6e, tighter on v7x)."""
    cap = 64 << 20
    try:
        info = pltpu.get_tpu_info()
        cap = int(getattr(info, "vmem_capacity_bytes", cap) or cap)
    except Exception:
        pass
    return max(32 << 20, min(int(cap * 0.85), 110 << 20))


def _compiler_params(semantics):
    return pltpu.CompilerParams(dimension_semantics=semantics,
                                vmem_limit_bytes=_vmem_limit_bytes())


# --------------------------------------------------------------------------- GELU (exact)
_INV_SQRT2 = 0.7071067811865476


def _erf_f32(z):
    # Abramowitz & Stegun 7.1.26, |err| <= 1.5e-7 (Mosaic-safe: exp + arithmetic only).
    a1, a2, a3, a4, a5 = 0.254829592, -0.284496736, 1.421413741, -1.453152027, 1.061405429
    p = 0.3275911
    az = jnp.abs(z)
    t = 1.0 / (1.0 + p * az)
    poly = ((((a5 * t + a4) * t + a3) * t + a2) * t + a1) * t
    e = 1.0 - poly * jnp.exp(-az * az)
    return jnp.where(z >= 0.0, e, -e)


def _gelu_exact(x):
    # torch.nn.GELU() default is the exact erf-based GELU.
    return 0.5 * x * (1.0 + _erf_f32(x * _INV_SQRT2))


def _rms_normalize(x_ref, eps):
    # torch rmsnorm semantics: compute in f32, return in the input dtype.
    xf = x_ref[...].astype(jnp.float32)
    inv = jax.lax.rsqrt(jnp.mean(xf * xf, axis=-1, keepdims=True) + eps)
    return (xf * inv).astype(x_ref.dtype)


# --------------------------------------------------------------------------- 1) RMSNorm + c_attn + rotary
def _rms_qkv_rope_kernel(x_ref, w_ref, perm_ref, cos_ref, sin_ref, o_ref, *, eps, two_h):
    s = pl.program_id(1)                            # which (qkv, head) weight slab
    xn = _rms_normalize(x_ref, eps)                 # fused RMSNorm prologue (full-K row tile)
    out = jnp.dot(xn, w_ref[0], preferred_element_type=jnp.float32)     # (tm, D) f32

    @pl.when(s < two_h)                             # q / k slabs: fused rotary embedding
    def _():
        # half-swap [x1|x2] -> [x2|x1] with a tiny resident (D,D) permutation matmul;
        # cost is D/C of the main matmul and it avoids lane-granular roll/concat of a
        # minor dim that is < 128 lanes.
        swapped = jnp.dot(out, perm_ref[...], preferred_element_type=jnp.float32)
        o_ref[0] = (out * cos_ref[...] + swapped * sin_ref[...]).astype(o_ref.dtype)

    @pl.when(s >= two_h)                            # v slabs: passthrough
    def _():
        o_ref[0] = out.astype(o_ref.dtype)


def rms_qkv_rope(x2d, w_heads, perm, cos_full, sin_sgn, *, T, eps):
    """x2d: (B*T, C); w_heads: (3H, C, D) -> qkv in head-major layout (3H, B*T, D)."""
    M, C = x2d.shape
    SH, _, D = w_heads.shape
    tm = _divisor_tile(T, 256, 8)                   # row tile aligned to sequence positions
    nq_per_b = T // tm
    grid = (M // tm, SH)
    return pl.pallas_call(
        functools.partial(_rms_qkv_rope_kernel, eps=eps, two_h=2 * (SH // 3)),
        out_shape=jax.ShapeDtypeStruct((SH, M, D), x2d.dtype),
        grid_spec=pltpu.PrefetchScalarGridSpec(
            num_scalar_prefetch=0,
            grid=grid,
            in_specs=[
                pl.BlockSpec((tm, C), lambda i, s: (i, 0)),              # x tile (resident across s)
                pl.BlockSpec((1, C, D), lambda i, s: (s, 0, 0)),         # per-(qkv,head) weight slab
                pl.BlockSpec((D, D), lambda i, s: (0, 0)),               # half-swap permutation
                pl.BlockSpec((tm, D), lambda i, s: (i % nq_per_b, 0)),   # [cos | cos]
                pl.BlockSpec((tm, D), lambda i, s: (i % nq_per_b, 0)),   # [sin | -sin]
            ],
            out_specs=pl.BlockSpec((1, tm, D), lambda i, s: (s, i, 0)),
        ),
        compiler_params=_compiler_params(("parallel", "parallel")),
    )(x2d, w_heads, perm, cos_full, sin_sgn)


# --------------------------------------------------------------------------- 2) flash causal attention
def _flash_attn_kernel(q_ref, k_ref, v_ref, o_ref, m_ref, l_ref, acc_ref, *, sm_scale, tq, tk):
    qi = pl.program_id(2)
    ki = pl.program_id(3)

    @pl.when(ki == 0)
    def _():
        m_ref[...] = jnp.full(m_ref.shape, -jnp.inf, m_ref.dtype)
        l_ref[...] = jnp.zeros(l_ref.shape, l_ref.dtype)
        acc_ref[...] = jnp.zeros(acc_ref.shape, acc_ref.dtype)

    # Skip key blocks entirely above the causal diagonal (halves QK^T / PV MXU work).
    @pl.when(ki * tk <= qi * tq + (tq - 1))
    def _():
        q = q_ref[0]                                                     # (tq, D)
        k = k_ref[0]                                                     # (tk, D)
        v = v_ref[0]                                                     # (tk, D)
        s = jax.lax.dot_general(q, k, (((1,), (1,)), ((), ())),
                                preferred_element_type=jnp.float32) * sm_scale
        # causal mask from two 1-D iotas (no (tq,tk) int32 materialization)
        row = qi * tq + jax.lax.broadcasted_iota(jnp.int32, (tq, 1), 0)
        col = ki * tk + jax.lax.broadcasted_iota(jnp.int32, (1, tk), 1)
        s = jnp.where(col <= row, s, -1e30)

        m_prev = m_ref[...]
        m_new = jnp.maximum(m_prev, jnp.max(s, axis=-1, keepdims=True))
        alpha = jnp.exp(m_prev - m_new)
        p = jnp.exp(s - m_new)
        l_ref[...] = alpha * l_ref[...] + jnp.sum(p, axis=-1, keepdims=True)
        acc_ref[...] = alpha * acc_ref[...] + jnp.dot(
            p.astype(v.dtype), v, preferred_element_type=jnp.float32)
        m_ref[...] = m_new

    @pl.when(ki == pl.num_programs(3) - 1)
    def _():
        o_ref[0] = (acc_ref[...] * pl.reciprocal(l_ref[...], approx=True)).astype(o_ref.dtype)


def flash_attention(qkv_heads, *, B, H, T, D):
    """qkv_heads: (3H, B*T, D) head-major layout (q: rows [0,H), k: [H,2H), v: [2H,3H))."""
    tq = _divisor_tile(T, 256, 8)
    tk = _divisor_tile(T, 512, 8)
    nq = T // tq
    nk = T // tk

    def q_map(b, h, qi, ki):
        return (h, b * nq + qi, 0)

    def _kv_row(b, qi, ki):
        # Clamp to the last causally-needed block: skipped blocks dedupe to the previous
        # block index, so Pallas elides their DMAs entirely.
        last = (qi * tq + (tq - 1)) // tk
        return b * nk + jnp.minimum(ki, last)

    def k_map(b, h, qi, ki):
        return (H + h, _kv_row(b, qi, ki), 0)

    def v_map(b, h, qi, ki):
        return (2 * H + h, _kv_row(b, qi, ki), 0)

    def o_map(b, h, qi, ki):
        return (h, b * nq + qi, 0)

    return pl.pallas_call(
        functools.partial(_flash_attn_kernel, sm_scale=1.0 / math.sqrt(D), tq=tq, tk=tk),
        out_shape=jax.ShapeDtypeStruct((H, B * T, D), qkv_heads.dtype),
        grid_spec=pltpu.PrefetchScalarGridSpec(
            num_scalar_prefetch=0,
            grid=(B, H, nq, nk),
            in_specs=[
                pl.BlockSpec((1, tq, D), q_map),
                pl.BlockSpec((1, tk, D), k_map),
                pl.BlockSpec((1, tk, D), v_map),
            ],
            out_specs=pl.BlockSpec((1, tq, D), o_map),
            scratch_shapes=[
                pltpu.VMEM((tq, 1), jnp.float32),   # running max
                pltpu.VMEM((tq, 1), jnp.float32),   # running denominator
                pltpu.VMEM((tq, D), jnp.float32),   # output accumulator
            ],
        ),
        compiler_params=_compiler_params(("parallel", "parallel", "parallel", "arbitrary")),
    )(qkv_heads, qkv_heads, qkv_heads)


# --------------------------------------------------------------------------- 3) attention c_proj (+residual)
def _attn_proj_kernel(y_ref, w_ref, r_ref, o_ref, acc_ref, *, scale):
    h = pl.program_id(2)

    @pl.when(h == 0)
    def _():
        acc_ref[...] = jnp.zeros(acc_ref.shape, acc_ref.dtype)

    acc_ref[...] += jnp.dot(y_ref[0], w_ref[0], preferred_element_type=jnp.float32)

    @pl.when(h == pl.num_programs(2) - 1)
    def _():
        o_ref[...] = (r_ref[...].astype(jnp.float32) + scale * acc_ref[...]).astype(o_ref.dtype)


def attn_proj_residual(y_heads, w_heads, residual, *, scale):
    """residual + scale * sum_h y_heads[h] @ w_heads[h]; y_heads: (H, M, D), w_heads: (H, D, C)."""
    H, M, D = y_heads.shape
    _, _, C = w_heads.shape
    tm = _divisor_tile(M, 256, 8)
    tn = _divisor_tile(C, 512, 128)
    grid = (M // tm, C // tn, H)
    return pl.pallas_call(
        functools.partial(_attn_proj_kernel, scale=scale),
        out_shape=jax.ShapeDtypeStruct((M, C), residual.dtype),
        grid_spec=pltpu.PrefetchScalarGridSpec(
            num_scalar_prefetch=0,
            grid=grid,
            in_specs=[
                pl.BlockSpec((1, tm, D), lambda i, j, h: (h, i, 0)),
                pl.BlockSpec((1, D, tn), lambda i, j, h: (h, 0, j)),
                pl.BlockSpec((tm, tn), lambda i, j, h: (i, j)),
            ],
            out_specs=pl.BlockSpec((tm, tn), lambda i, j, h: (i, j)),
            scratch_shapes=[pltpu.VMEM((tm, tn), jnp.float32)],
        ),
        compiler_params=_compiler_params(("parallel", "parallel", "arbitrary")),
    )(y_heads, w_heads, residual)


# --------------------------------------------------------------------------- 4) RMSNorm + c_fc + GELU
def _rms_linear_kernel(x_ref, w_ref, o_ref, *, eps, activation):
    xn = _rms_normalize(x_ref, eps)
    acc = jnp.dot(xn, w_ref[...], preferred_element_type=jnp.float32)
    if activation == "gelu":
        acc = _gelu_exact(acc)
    o_ref[...] = acc.astype(o_ref.dtype)


def rms_linear(x2d, w, *, eps, activation=None):
    """act((rmsnorm(x)) @ w). Full-K row tiles because the RMSNorm needs the whole row."""
    M, K = x2d.shape
    _, N = w.shape
    tm = _divisor_tile(M, 256, 8)
    tn = _divisor_tile(N, 512, 128)
    grid = (M // tm, N // tn)
    return pl.pallas_call(
        functools.partial(_rms_linear_kernel, eps=eps, activation=activation),
        out_shape=jax.ShapeDtypeStruct((M, N), x2d.dtype),
        grid_spec=pltpu.PrefetchScalarGridSpec(
            num_scalar_prefetch=0,
            grid=grid,
            in_specs=[
                pl.BlockSpec((tm, K), lambda i, j: (i, 0)),
                pl.BlockSpec((K, tn), lambda i, j: (0, j)),
            ],
            out_specs=pl.BlockSpec((tm, tn), lambda i, j: (i, j)),
        ),
        compiler_params=_compiler_params(("parallel", "parallel")),
    )(x2d, w)


# --------------------------------------------------------------------------- 5) K-tiled MLP c_proj (+residual)
def _kacc_proj_kernel(u_ref, w_ref, r_ref, o_ref, acc_ref, *, scale):
    k = pl.program_id(2)

    @pl.when(k == 0)
    def _():
        acc_ref[...] = jnp.zeros(acc_ref.shape, acc_ref.dtype)

    acc_ref[...] += jnp.dot(u_ref[...], w_ref[...], preferred_element_type=jnp.float32)

    @pl.when(k == pl.num_programs(2) - 1)
    def _():
        o_ref[...] = (r_ref[...].astype(jnp.float32) + scale * acc_ref[...]).astype(o_ref.dtype)


def kacc_proj_residual(u, w, residual, *, scale):
    """residual + scale * (u @ w), K-tiled with a VMEM accumulator."""
    M, K = u.shape
    _, N = w.shape
    tm = _divisor_tile(M, 256, 8)
    tn = _divisor_tile(N, 512, 128)
    tk = _divisor_tile(K, 512, 128)      # must divide K exactly (no garbage in the accumulator)
    grid = (M // tm, N // tn, K // tk)
    return pl.pallas_call(
        functools.partial(_kacc_proj_kernel, scale=scale),
        out_shape=jax.ShapeDtypeStruct((M, N), residual.dtype),
        grid_spec=pltpu.PrefetchScalarGridSpec(
            num_scalar_prefetch=0,
            grid=grid,
            in_specs=[
                pl.BlockSpec((tm, tk), lambda i, j, k: (i, k)),
                pl.BlockSpec((tk, tn), lambda i, j, k: (k, j)),
                pl.BlockSpec((tm, tn), lambda i, j, k: (i, j)),
            ],
            out_specs=pl.BlockSpec((tm, tn), lambda i, j, k: (i, j)),
            scratch_shapes=[pltpu.VMEM((tm, tn), jnp.float32)],
        ),
        compiler_params=_compiler_params(("parallel", "parallel", "arbitrary")),
    )(u, w, residual)


# --------------------------------------------------------------------------- Block forward
def _rotary_tables(T, D, base=10000.0):
    # Mirrors the Rotary module's cached cos/sin buffers (tiny, precomputed wrapper-side).
    inv_freq = 1.0 / (base ** (jnp.arange(0, D, 2, dtype=jnp.float32) / D))
    freqs = jnp.outer(jnp.arange(T, dtype=jnp.float32), inv_freq)   # (T, D//2)
    cos, sin = jnp.cos(freqs), jnp.sin(freqs)
    cos_full = jnp.concatenate([cos, cos], axis=-1)                 # (T, D)  [cos | cos]
    sin_sgn = jnp.concatenate([sin, -sin], axis=-1)                 # (T, D)  [sin | -sin]
    return cos_full, sin_sgn


def _half_swap_perm(D):
    eye = jnp.eye(D, dtype=jnp.float32)
    d2 = D // 2
    return jnp.concatenate([eye[:, d2:], eye[:, :d2]], axis=1)      # x @ perm == [x2 | x1]


def block_forward(x, params, *, n_head, n_layer, eps=1e-6):
    B, T, C = x.shape
    H = n_head
    D = C // H
    assert C % H == 0 and D % 2 == 0
    assert T % 8 == 0, "sequence length must be a multiple of 8 (sublane granule)"
    attn_scale = 1.0 / math.sqrt(2 * n_layer)
    x2d = x.reshape(B * T, C)

    # One-time weight layout prep (in a real model this lives in the checkpoint loader):
    # c_attn columns are ordered (qkv, head, d) -> head-major slabs (3H, C, D);
    # c_proj rows are ordered (head, d) -> (H, D, C) (pure reshape).
    w_qkv_heads = (params["w_attn"].reshape(C, 3, H, D)
                   .transpose(1, 2, 0, 3).reshape(3 * H, C, D))
    w_proj_heads = params["w_attn_proj"].reshape(H, D, C)

    cos_full, sin_sgn = _rotary_tables(T, D)
    perm = _half_swap_perm(D)

    # --- attention branch: x = x + attn_scale * c_proj(attn(rope(c_attn(rmsnorm(x))))) ---
    qkv_heads = rms_qkv_rope(x2d, w_qkv_heads, perm, cos_full, sin_sgn, T=T, eps=eps)
    y_heads = flash_attention(qkv_heads, B=B, H=H, T=T, D=D)
    x2d = attn_proj_residual(y_heads, w_proj_heads, x2d, scale=attn_scale)

    # --- MLP branch: x = x + c_proj(gelu(c_fc(rmsnorm(x)))) ---
    # TODO(synk): MLP bias (config.bias) assumed False like the attention Linears; add a
    # bias-add epilogue if a biased checkpoint is used.
    u = rms_linear(x2d, params["w_fc"], eps=eps, activation="gelu")
    # TODO(synk): nn.Dropout(p) at inference (p=0) is the identity; no kernel emitted.
    x2d = kacc_proj_residual(u, params["w_mlp_proj"], x2d, scale=1.0)

    return x2d.reshape(B, T, C)


# --------------------------------------------------------------------------- reference (pure JAX)
def _reference_block(x, params, *, n_head, n_layer, eps=1e-6):
    P = jax.lax.Precision.HIGHEST
    B, T, C = x.shape
    H = n_head
    D = C // H

    def rms(v):
        vf = v.astype(jnp.float32)
        return (vf * jax.lax.rsqrt(jnp.mean(vf * vf, axis=-1, keepdims=True) + eps)).astype(v.dtype)

    def rope(v, cos, sin):
        d = v.shape[-1] // 2
        x1, x2 = v[..., :d], v[..., d:]
        return jnp.concatenate([x1 * cos + x2 * sin, -x1 * sin + x2 * cos], axis=-1)

    inv_freq = 1.0 / (10000.0 ** (jnp.arange(0, D, 2, dtype=jnp.float32) / D))
    freqs = jnp.outer(jnp.arange(T, dtype=jnp.float32), inv_freq)
    cos = jnp.cos(freqs)[None, :, None, :]
    sin = jnp.sin(freqs)[None, :, None, :]

    h = rms(x)
    qkv = jnp.dot(h, params["w_attn"], precision=P)
    q, k, v = jnp.split(qkv, 3, axis=-1)
    q = rope(q.reshape(B, T, H, D), cos, sin).transpose(0, 2, 1, 3)
    k = rope(k.reshape(B, T, H, D), cos, sin).transpose(0, 2, 1, 3)
    v = v.reshape(B, T, H, D).transpose(0, 2, 1, 3)
    s = jnp.einsum("bhqd,bhkd->bhqk", q, k, precision=P) / math.sqrt(D)
    mask = jnp.tril(jnp.ones((T, T), dtype=bool))
    s = jnp.where(mask, s, -jnp.inf)
    p = jax.nn.softmax(s, axis=-1)
    y = jnp.einsum("bhqk,bhkd->bhqd", p, v, precision=P)
    y = y.transpose(0, 2, 1, 3).reshape(B, T, C)
    y = jnp.dot(y, params["w_attn_proj"], precision=P)
    x = x + (1.0 / math.sqrt(2 * n_layer)) * y

    h = rms(x)
    u = jax.nn.gelu(jnp.dot(h, params["w_fc"], precision=P), approximate=False)
    x = x + jnp.dot(u, params["w_mlp_proj"], precision=P)
    return x


# --------------------------------------------------------------------------- main
if __name__ == "__main__":
    B, T, C = 2, 8, 32
    n_head, n_layer = 4, 2

    key = jax.random.PRNGKey(0)
    kx, k1, k2, k3, k4 = jax.random.split(key, 5)
    x = jax.random.normal(kx, (B, T, C), dtype=jnp.float32)
    params = {
        "w_attn": (1.0 / math.sqrt(C)) * jax.random.normal(k1, (C, 3 * C), dtype=jnp.float32),
        "w_attn_proj": (1.0 / math.sqrt(C)) * jax.random.normal(k2, (C, C), dtype=jnp.float32),
        "w_fc": (1.0 / math.sqrt(C)) * jax.random.normal(k3, (C, 4 * C), dtype=jnp.float32),
        "w_mlp_proj": (1.0 / math.sqrt(4 * C)) * jax.random.normal(k4, (4 * C, C), dtype=jnp.float32),
    }

    y = block_forward(x, params, n_head=n_head, n_layer=n_layer)
    y = jax.block_until_ready(y)

    y_ref = _reference_block(x, params, n_head=n_head, n_layer=n_layer)
    y_ref = jax.block_until_ready(y_ref)

    assert y.shape == x.shape
    assert jnp.allclose(y, y_ref, atol=2e-3, rtol=2e-3), "mismatch vs reference"
    print("KERNEL_OK")
</pallas_src>

<mosaic_0001>
module attributes {stable_mosaic.version = 11 : i64} {
  func.func @_rms_qkv_rope_kernel(%arg0: i32, %arg1: i32, %arg2: memref<8x32xf32, #tpu.memory_space<vmem>>, %arg3: memref<1x32x8xf32, #tpu.memory_space<vmem>>, %arg4: memref<8x8xf32, #tpu.memory_space<vmem>>, %arg5: memref<8x8xf32, #tpu.memory_space<vmem>>, %arg6: memref<8x8xf32, #tpu.memory_space<vmem>>, %arg7: memref<1x8x8xf32, #tpu.memory_space<vmem>>) attributes {dimension_semantics = [#tpu.dimension_semantics<parallel>, #tpu.dimension_semantics<parallel>], iteration_bounds = array<i64: 2, 12>, scalar_prefetch = 0 : i64, scratch_operands = 0 : i64, tpu.core_type = #tpu.core_type<tc>, window_params = [{transform_indices = @transform_0, window_bounds = array<i64: 8, 32>}, {transform_indices = @transform_1, window_bounds = array<i64: 1, 32, 8>}, {pipeline_mode = #tpu.pipeline_mode<synchronous>, transform_indices = @transform_2, window_bounds = array<i64: 8, 8>}, {transform_indices = @transform_3, window_bounds = array<i64: 8, 8>}, {transform_indices = @transform_4, window_bounds = array<i64: 8, 8>}, {transform_indices = @transform_5, window_bounds = array<i64: 1, 8, 8>}]} {
    %c0 = arith.constant 0 : index
    %c0_0 = arith.constant 0 : index
    %0 = vector.load %arg2[%c0, %c0_0] : memref<8x32xf32, #tpu.memory_space<vmem>>, vector<8x32xf32>
    %1 = arith.mulf %0, %0 : vector<8x32xf32>
    %cst = arith.constant dense<0.000000e+00> : vector<8xf32>
    %2 = vector.multi_reduction <add>, %1, %cst [1] : vector<8x32xf32> to vector<8xf32>
    %3 = vector.shape_cast %2 : vector<8xf32> to vector<8x1xf32>
    %cst_1 = arith.constant 3.200000e+01 : f32
    %4 = vector.broadcast %cst_1 : f32 to vector<8x1xf32>
    %5 = arith.divf %3, %4 : vector<8x1xf32>
    %cst_2 = arith.constant 9.99999997E-7 : f32
    %6 = vector.broadcast %cst_2 : f32 to vector<8x1xf32>
    %7 = arith.addf %5, %6 : vector<8x1xf32>
    %8 = math.rsqrt %7 : vector<8x1xf32>
    %9 = vector.broadcast %8 : vector<8x1xf32> to vector<8x32xf32>
    %10 = arith.mulf %0, %9 : vector<8x32xf32>
    %c0_3 = arith.constant 0 : index
    %c0_4 = arith.constant 0 : index
    %c0_5 = arith.constant 0 : index
    %11 = vector.load %arg3[%c0_3, %c0_4, %c0_5] : memref<1x32x8xf32, #tpu.memory_space<vmem>>, vector<1x32x8xf32>
    %12 = vector.shape_cast %11 : vector<1x32x8xf32> to vector<32x8xf32>
    %cst_6 = arith.constant dense<0.000000e+00> : vector<8x8xf32>
    %13 = tpu.matmul %10, %12, %cst_6 {dimension_numbers = #tpu.dot_dimension_numbers<[1], [0], [0], [1], [0, 0, 1, 1], [], []>} : vector<8x32xf32>, vector<32x8xf32>, vector<8x8xf32> -> vector<8x8xf32>
    %c8_i32 = arith.constant 8 : i32
    %14 = arith.cmpi slt, %arg1, %c8_i32 : i32
    %15 = arith.extui %14 : i1 to i32
    %c0_i32 = arith.constant 0 : i32
    %16 = arith.cmpi ne, %15, %c0_i32 : i32
    scf.if %16 {
      %c0_9 = arith.constant 0 : index
      %c0_10 = arith.constant 0 : index
      %20 = vector.load %arg4[%c0_9, %c0_10] : memref<8x8xf32, #tpu.memory_space<vmem>>, vector<8x8xf32>
      %cst_11 = arith.constant dense<0.000000e+00> : vector<8x8xf32>
      %21 = tpu.matmul %13, %20, %cst_11 {dimension_numbers = #tpu.dot_dimension_numbers<[1], [0], [0], [1], [0, 0, 1, 1], [], []>} : vector<8x8xf32>, vector<8x8xf32>, vector<8x8xf32> -> vector<8x8xf32>
      %c0_12 = arith.constant 0 : index
      %c0_13 = arith.constant 0 : index
      %22 = vector.load %arg5[%c0_12, %c0_13] : memref<8x8xf32, #tpu.memory_space<vmem>>, vector<8x8xf32>
      %23 = arith.mulf %13, %22 : vector<8x8xf32>
      %c0_14 = arith.constant 0 : index
      %c0_15 = arith.constant 0 : index
      %24 = vector.load %arg6[%c0_14, %c0_15] : memref<8x8xf32, #tpu.memory_space<vmem>>, vector<8x8xf32>
      %25 = arith.mulf %21, %24 : vector<8x8xf32>
      %26 = arith.addf %23, %25 : vector<8x8xf32>
      %c0_16 = arith.constant 0 : index
      %c0_17 = arith.constant 0 : index
      %c0_18 = arith.constant 0 : index
      %27 = vector.load %arg7[%c0_16, %c0_17, %c0_18] : memref<1x8x8xf32, #tpu.memory_space<vmem>>, vector<1x8x8xf32>
      %28 = vector.shape_cast %27 : vector<1x8x8xf32> to vector<8x8xf32>
      %29 = vector.shape_cast %26 : vector<8x8xf32> to vector<1x8x8xf32>
      tpu.vector_store %arg7[%c0_16, %c0_17, %c0_18], %29 {strides = array<i32>} : memref<1x8x8xf32, #tpu.memory_space<vmem>>, vector<1x8x8xf32>,
    } else {
    }
    %c8_i32_7 = arith.constant 8 : i32
    %17 = arith.cmpi sge, %arg1, %c8_i32_7 : i32
    %18 = arith.extui %17 : i1 to i32
    %c0_i32_8 = arith.constant 0 : i32
    %19 = arith.cmpi ne, %18, %c0_i32_8 : i32
    scf.if %19 {
      %c0_9 = arith.constant 0 : index
      %c0_10 = arith.constant 0 : index
      %c0_11 = arith.constant 0 : index
      %20 = vector.load %arg7[%c0_9, %c0_10, %c0_11] : memref<1x8x8xf32, #tpu.memory_space<vmem>>, vector<1x8x8xf32>
      %21 = vector.shape_cast %20 : vector<1x8x8xf32> to vector<8x8xf32>
      %22 = vector.shape_cast %13 : vector<8x8xf32> to vector<1x8x8xf32>
      tpu.vector_store %arg7[%c0_9, %c0_10, %c0_11], %22 {strides = array<i32>} : memref<1x8x8xf32, #tpu.memory_space<vmem>>, vector<1x8x8xf32>,
    } else {
    }
    return
  }
  func.func @transform_0(%arg0: i32, %arg1: i32) -> (i32, i32) {
    %c0_i32 = arith.constant 0 : i32
    %c0_i32_0 = arith.constant 0 : i32
    return %arg0, %c0_i32 : i32, i32
  }
  func.func @transform_1(%arg0: i32, %arg1: i32) -> (i32, i32, i32) {
    %c0_i32 = arith.constant 0 : i32
    %c0_i32_0 = arith.constant 0 : i32
    %c0_i32_1 = arith.constant 0 : i32
    return %arg1, %c0_i32, %c0_i32_0 : i32, i32, i32
  }
  func.func @transform_2(%arg0: i32, %arg1: i32) -> (i32, i32) {
    %c0_i32 = arith.constant 0 : i32
    %c0_i32_0 = arith.constant 0 : i32
    %c0_i32_1 = arith.constant 0 : i32
    return %c0_i32, %c0_i32_0 : i32, i32
  }
  func.func @transform_3(%arg0: i32, %arg1: i32) -> (i32, i32) {
    %c1_i32 = arith.constant 1 : i32
    %c0_i32 = arith.constant 0 : i32
    %0 = arith.cmpi eq, %c1_i32, %c0_i32 : i32
    %c1_i32_0 = arith.constant 1 : i32
    %1 = arith.select %0, %c1_i32_0, %c1_i32 : i32
    %2 = arith.remsi %arg0, %1 : i32
    %c0_i32_1 = arith.constant 0 : i32
    %3 = arith.cmpi ne, %2, %c0_i32_1 : i32
    %c0_i32_2 = arith.constant 0 : i32
    %4 = arith.cmpi slt, %2, %c0_i32_2 : i32
    %c0_i32_3 = arith.constant 0 : i32
    %5 = arith.cmpi slt, %1, %c0_i32_3 : i32
    %6 = arith.xori %4, %5 : i1
    %7 = arith.andi %6, %3 : i1
    %8 = arith.addi %2, %1 : i32
    %9 = arith.select %7, %8, %2 : i32
    %c0_i32_4 = arith.constant 0 : i32
    %c0_i32_5 = arith.constant 0 : i32
    return %9, %c0_i32_4 : i32, i32
  }
  func.func @transform_4(%arg0: i32, %arg1: i32) -> (i32, i32) {
    %c1_i32 = arith.constant 1 : i32
    %c0_i32 = arith.constant 0 : i32
    %0 = arith.cmpi eq, %c1_i32, %c0_i32 : i32
    %c1_i32_0 = arith.constant 1 : i32
    %1 = arith.select %0, %c1_i32_0, %c1_i32 : i32
    %2 = arith.remsi %arg0, %1 : i32
    %c0_i32_1 = arith.constant 0 : i32
    %3 = arith.cmpi ne, %2, %c0_i32_1 : i32
    %c0_i32_2 = arith.constant 0 : i32
    %4 = arith.cmpi slt, %2, %c0_i32_2 : i32
    %c0_i32_3 = arith.constant 0 : i32
    %5 = arith.cmpi slt, %1, %c0_i32_3 : i32
    %6 = arith.xori %4, %5 : i1
    %7 = arith.andi %6, %3 : i1
    %8 = arith.addi %2, %1 : i32
    %9 = arith.select %7, %8, %2 : i32
    %c0_i32_4 = arith.constant 0 : i32
    %c0_i32_5 = arith.constant 0 : i32
    return %9, %c0_i32_4 : i32, i32
  }
  func.func @transform_5(%arg0: i32, %arg1: i32) -> (i32, i32, i32) {
    %c0_i32 = arith.constant 0 : i32
    %c0_i32_0 = arith.constant 0 : i32
    return %arg1, %arg0, %c0_i32 : i32, i32, i32
  }
}

</mosaic_0001>

<bundles_post_ra>
// kernel: tpu_custom_call.1
= control target key start
LH: loop header
LB: loop body
LE: loop exit
PB: predicated region body
PF: predicated region fallthrough
CT: control target
= control target key end

     0   :  { %s701_s18 = smov 0   ;;  %s703_s19 = smov 0   ;;  %s776_s0 = inlined_call_operand.vmem [shape: f32[16,32], index: 0, kind: input, shape index: {}]   ;;  %s777_s1 = inlined_call_operand.vmem [shape: f32[12,32,8], index: 1, kind: input, shape index: {}]   ;;  %s778_s2 = inlined_call_operand.vmem [shape: f32[8,8], index: 2, kind: input, shape index: {}]   ;;  %s779_s3 = inlined_call_operand.vmem [shape: f32[8,8], index: 3, kind: input, shape index: {}]   ;;  %s780_s4 = inlined_call_operand.vmem [shape: f32[8,8], index: 4, kind: input, shape index: {}]   ;;  %s781_s5 = inlined_call_operand.vmem [shape: f32[12,16,8], index: 5, kind: output, shape index: {}]  }
   0x1   :  { %s705_s20 = smov 0   ;;  %s707_s21 = smov 0  }
   0x2   :  { %s709_s22 = smov 0  }
   0x3 LB: > { %s24_s23 = sadd.s32 1, %s656_s20  ;;  %s27_s24 = sadd.s32 1, %s660_s21  ;;  %s664_s22 = sphi %s709_s22, %s15_s22   ;;  %s660_s21 = sphi %s707_s21, %s785_s21   ;;  %s656_s20 = sphi %s705_s20, %s784_s20   ;;  %s652_s19 = sphi %s703_s19, %s783_s19   ;;  %s648_s18 = sphi %s701_s18, %s782_s18  }
   0x4   : > { %p25_p0 = scmp.ge.s32.totalorder %s24_s23, 12  ;;  %p537_p1 = scmp.ge.s32.totalorder %s664_s22, 1 }
   0x5   : > { %p210_p2 = scmp.lt.s32.totalorder %s664_s22, 25 }
   0x6   : > { %s787_s23 = smov (%p25_p0, %s24_s23), 0  ;;  %s789_s24 = smov (!%p25_p0, %s27_s24), %s660_s21 }
   0x7   : > { %p211_p3 = pnand %p537_p1, %p210_p2  ;;  %p29_p4 = scmp.ge.s32.totalorder %s789_s24, 2 }
   0x8   : > { %p245_p5 = scmp.lt.s32.totalorder (!%p211_p3), %s652_s19, 1  ;;  %p249_p6 = scmp.lt.s32.totalorder (!%p211_p3), %s648_s18, 11  ;;  %vm264_vm0 = vcmask (!%p211_p3), 261120   ;;  %v666_v3 = vmov (!%p211_p3), 0.0|0.0   ;;  %vm667_vm1 = vmmov (!%p211_p3), 0   ;;  %v668_v4 = vmov (!%p211_p3), 0.0  }
   0x9   : > { %s791_s24 = smov (%p29_p4, %s789_s24), 0  ;;  %214 = sbr.rel (%p211_p3) target bundleno = 621 (0x26d), region = 40 }
   0xa   : > { %573 = vmatprep.subr.bf16.mxu0 (!%p211_p3), %v666_v3  ;;  %565 = vmatprep.mubr.msk.f32.mxu0 (!%p211_p3), %vm667_vm1, %v668_v4  ;;  %p544_p7 = scmp.ge.s32.totalorder (!%p211_p3), %s648_s18, 8 }
  0x10   : > { %s793_s19 = smov (!%p245_p5, %s652_s19), 1  ;;  %v354_v18 = vld [vmem:[%s778_s2] sm:$0xff] (!%p544_p7)  ;;  %vm355_vm2 = vcmask (!%p544_p7), 64512   ;;  %v669_v19 = vmov (!%p544_p7), 0.0   ;;  %vm670_vm3 = vmmov (!%p544_p7), 0  }
  0x11   : > { %s250_s25 = scalar_select %p249_p6, %s648_s18, 11 }
  0x12   : > { %s538_s26 = sshll.u32 %s793_s19, 3  ;;  %v429_v20 = vld [vmem:[%s779_s3] sm:$0xff] (!%p544_p7) }
  0x13   : > { %s248_s29 = scalar_lea.vmem %s776_s0, %s538_s26  ;;  %s541_s30 = sshll.u32 %s250_s25, 1  ;;  %v431_v21 = vld [vmem:[%s780_s4] sm:$0xff] (!%p544_p7) }
  0x14   : > { %s259_s6 = sadd.s32 %s541_s30, %s793_s19  ;;  %v262_v0 = vld [vmem:[%s248_s29] sm:$0xff]  ;;  %s549_s11 = sshll.u32 %s250_s25, 5 }
  0x15   : > { %s542_s7 = sshll.u32 %s259_s6, 3  ;;  %v263_v1 = vmul.f32 %v262_v0, %v262_v0  ;;  %s253_s14 = scalar_lea.vmem %s777_s1, %s549_s11 }
  0x16   : > { %s741_s10 = scalar_lea.vmem %s781_s5, %s542_s7  ;;  %v273_v5 = vld [vmem:[%s253_s14] sm:$0xff]  ;;  %v274_v6 = vld [vmem:[%s253_s14 + $0x8] sm:$0xff]  ;;  %v275_v7 = vld [vmem:[%s253_s14 + $0x10] sm:$0xff] }
  0x17   : > { %v265_v2 = vsel %vm264_vm0, %v263_v1, 0.0  ;;  %v574_v8 = vpack.c.bf16 %v274_v6, %v273_v5  ;;  %v276_v9 = vld [vmem:[%s253_s14 + $0x18] sm:$0xff] }
  0x18   : > { %266 = vadd.xlane.f32.xlu0 %v265_v2  ;;  %v577_v10 = vpack.c.bf16 %v276_v9, %v275_v7 }
  0x19   : > { %575 = vmatpush3.bf16.msra.mxu0 %v574_v8 }
  0x1a   : > { %576 = vmatprep.subr.bf16.mxu0 %v666_v3 }
  0x1d   : > { %578 = vmatpush3.bf16.msra.mxu0 %v577_v10 }
  0x1e   : > { %568 = vmatprep.subr.mxu0 (!%p544_p7), %v669_v19 }
  0xa5   : > { %v267_v11 = vpop.xlane.xlu0 %266 }
  0xa6   : > { %v269_v12 = vmul.f32 0.03125, %v267_v11 }
  0xa8   : > { %v270_v13 = vadd.f32 1e-06, %v269_v12 }
  0xaa   : > { %624 = vrsqrt.f32 %v270_v13 }
  0xb4   : > { %v625_v14 = vpop.eup %624 }
  0xb5   : > { %v272_v15 = vmul.f32 %v625_v14, %v262_v0 }
  0xb7   : > { %566 = vmatmul.mubr.msk.f32.vlgmr.msra.gmra.mrb[0].mxu0 %vm264_vm0, %v272_v15 }
  0xb8   : > { %570 = vmatprep.mubr.msk.f32.mxu0 (!%p544_p7), %vm670_vm3, %v669_v19  ;;  %569 = vmatpush3.msra.mxu0 (!%p544_p7), %v354_v18 }
 0x185   : > { %353 = sbr.rel (%p544_p7) target bundleno = 612 (0x264), region = 44 }
 0x18a   : > { %v346_v16 = vpop.f32.mrb[0].mxu0 }
 0x18b   : > { %v567_v17 = vpop.f32.mrb[1].mxu0  ;;  %571 = vmatmul.mubr.msk.f32.vlgmr.msra.gmra.mrb[0].mxu0 (!%p544_p7), %vm355_vm2, %v346_v16  ;;  %v430_v22 = vmul.f32 (!%p544_p7), %v429_v20, %v346_v16 }
 0x25e   : > { %v425_v23 = vpop.f32.mrb[0].mxu0 }
 0x25f   : > { %v432_v24 = vmul.f32 %v431_v21, %v425_v23  ;;  %v572_v25 = vpop.f32.mrb[1].mxu0 }
 0x261   : > { %v433_v26 = vadd.f32 %v432_v24, %v430_v22 }
 0x263   : > { %434 = vst.msk [vmem:[%s741_s10] sm:$0xff] %vm355_vm2, %v433_v26 }
 0x264 PF: > { %p546_p8 = scmp.lt.s32.totalorder %s648_s18, 8 }
 0x265   : > { %vm439_vm4 = vcmask (!%p546_p8), 64512  }
 0x266   : > { %438 = sbr.rel (%p546_p8) target bundleno = 621 (0x26d), region = 48  ;;  %440 = vst.msk [vmem:[%s741_s10] sm:$0xff] (!%p546_p8), %vm439_vm4, %v346_v16 }
 0x26d PF: > { %s15_s22 = sadd.s32 1, %s664_s22   ;;  %s782_s18 = smov %s656_s20 }
 0x26e   : > { %p12_p9 = scmp.ge.s32.totalorder %s15_s22, 26   ;;  %s783_s19 = smov %s660_s21 }
 0x26f   : > { %s784_s20 = smov %s787_s23  ;;  %s785_s21 = smov %s791_s24 }
 0x270   :  { %14 = sbr.rel (!%p12_p9) target bundleno = 3 (0x3), region = 81 }

</bundles_post_ra>
